<compile_context>
chip_gen: v7x
topology: tpu7x:2x2x1
jax: 0.10.0
libtpu: 0.0.40
codegen_flags: <defaults>
</compile_context>

<pallas_src>
import functools

import jax
import jax.numpy as jnp
from jax.experimental import pallas as pl
from jax.experimental.pallas import tpu as pltpu


def _l2norm(x, eps=1e-12):
    # matches torch.nn.functional.normalize(dim=-1, eps=1e-12):
    # x / max(||x||, eps)  ==  x * rsqrt(max(||x||^2, eps^2))   (single EUP op)
    ss = jnp.sum(x * x, axis=-1, keepdims=True)
    return x * jax.lax.rsqrt(jnp.maximum(ss, eps * eps))


# --------------------------- one-shot text branch ---------------------------
def text_proj_kernel(text_ref, wt_ref, bt_ref, ntf_ref):
    """text_proj on CLS tokens + L2-normalize: [L, Dt] -> [L, E] f32."""
    tfr = jnp.dot(text_ref[...], wt_ref[...],
                  preferred_element_type=jnp.float32) + bt_ref[...]
    ntf_ref[...] = _l2norm(tfr)


# --------------------- per-batch-block head (gridded) -----------------------
def head_block_kernel(video_ref, wv_ref, bv_ref, ntf_t_ref, ntf_s_ref,
                      tgt_ref, loss_ref, *, nb, t):
    """vision_proj + patch_alignment_val_mod + contrastive CE (per sample).

    video_ref : [nb*T, Dv] VMEM bf16   (this block's flattened tokens)
    wv_ref    : [Dv, E]    VMEM bf16   (resident across grid steps)
    bv_ref    : [1, E]     VMEM f32
    ntf_t_ref : [E, L]     VMEM bf16   (normalized text feats, pre-transposed)
    ntf_s_ref : [L, E]     VMEM f32    (normalized text feats * 1/temp)
    tgt_ref   : [nb, L]    VMEM f32    (one-hot sim_targets rows)
    loss_ref  : [nb, 1]    VMEM f32    (per-sample loss, summed in wrapper)
    """
    # ---- vision_proj over all nb*T tokens in one MXU call (bf16 in, f32 acc)
    vfr2 = jnp.dot(video_ref[...], wv_ref[...],
                   preferred_element_type=jnp.float32) + bv_ref[...]   # [nb*T, E]
    nvf2 = _l2norm(vfr2)                                               # f32

    # ---- patch alignment scores, bf16 operands / f32 accumulation ----
    scores = jnp.dot(nvf2.astype(jnp.bfloat16), ntf_t_ref[...],
                     preferred_element_type=jnp.float32)               # [nb*T, L]
    act = jax.nn.sigmoid(scores * 10.0)                                # f32 gating

    # ---- re-weighting: video_feat[n,l,e] = sum_t act[n,t,l] * vfr[n,t,e] ----
    act3 = act.reshape(nb, t, act.shape[-1]).astype(jnp.bfloat16)      # [nb, T, L]
    vfr3 = vfr2.reshape(nb, t, vfr2.shape[-1]).astype(jnp.bfloat16)    # [nb, T, E]
    vf = jnp.einsum('ntl,nte->nle', act3, vfr3,
                    preferred_element_type=jnp.float32)                # [nb, L, E]
    vfn = _l2norm(vf)                                                  # f32

    # ---- sim_i2t / temp (temp folded into ntf_s), log-softmax CE ----
    sim = jnp.sum(vfn * ntf_s_ref[...][None, :, :], axis=-1)           # [nb, L] f32
    m = jnp.max(sim, axis=1, keepdims=True)
    lse = m + jnp.log(jnp.sum(jnp.exp(sim - m), axis=1, keepdims=True))
    logsm = sim - lse                                                  # log_softmax
    loss_ref[...] = -jnp.sum(logsm * tgt_ref[...], axis=1, keepdims=True)


# ------------------------------- wrapper -------------------------------------
def _pick_batch_block(n, t, dv, e, l, vmem_budget_bytes=24 << 20):
    """Batch block size from a VMEM budget.

    ~24 MiB of live block intermediates keeps a double-buffered pipeline within
    v7x's 64 MiB physical VMEM (with headroom); v5e/v6e (128 MiB) can pass a
    2-4x larger budget.
    """
    per_sample = (4 * (2 * t * e + t * l + 2 * l * e + 4 * l)     # f32 intermediates
                  + 2 * (2 * t * dv + t * l + 2 * t * e))         # bf16 inputs/casts
    nb = max(1, vmem_budget_bytes // max(per_sample, 1))
    if nb >= n:
        return n                       # single block: full-extent dims are legal
    return max(8, (nb // 8) * 8)       # multi-block: keep sublane dims 8-aligned


def recognizerplus_loss(video_embeds, text_cls, wv, bv, wt, bt,
                        sim_targets, temp, *, nb=None):
    """Shapes/params glue + pallas_calls. Returns scalar loss."""
    n, t, dv = video_embeds.shape
    l, _ = text_cls.shape
    e = wv.shape[1]

    vmem = pl.BlockSpec(memory_space=pltpu.MemorySpace.VMEM)

    # ---- text branch: one-shot Pallas call, hoisted out of the batch grid ----
    ntf = pl.pallas_call(
        text_proj_kernel,
        out_shape=jax.ShapeDtypeStruct((l, e), jnp.float32),
        in_specs=[vmem, vmem, vmem],
        out_specs=vmem,
    )(text_cls.astype(jnp.bfloat16),
      wt.astype(jnp.bfloat16),
      bt.reshape(1, -1).astype(jnp.float32))

    # bf16 [E, L] operand for the in-loop scores matmul (no XLU transpose in
    # the hot kernel) and f32 [L, E] operand with clamped 1/temp folded in.
    inv_temp = 1.0 / jnp.clip(temp, 0.001, 0.5)
    ntf_t = jnp.transpose(ntf).astype(jnp.bfloat16)        # [E, L] bf16
    ntf_s = (ntf * inv_temp).astype(jnp.float32)           # [L, E] f32

    # ---- pick batch block, pad N so it tiles cleanly ----
    if nb is None:
        nb = _pick_batch_block(n, t, dv, e, l)
    n_pad = pl.cdiv(n, nb) * nb
    if n_pad != n:
        pad = n_pad - n
        video_embeds = jnp.concatenate(
            [video_embeds, jnp.zeros((pad, t, dv), video_embeds.dtype)], axis=0)
        sim_targets = jnp.concatenate(
            [sim_targets, jnp.zeros((pad, l), sim_targets.dtype)], axis=0)
    num_blocks = n_pad // nb

    video_flat = video_embeds.reshape(n_pad * t, dv).astype(jnp.bfloat16)
    kernel = functools.partial(head_block_kernel, nb=nb, t=t)

    per_sample = pl.pallas_call(
        kernel,
        out_shape=jax.ShapeDtypeStruct((n_pad, 1), jnp.float32),
        grid=(num_blocks,),
        in_specs=[
            pl.BlockSpec((nb * t, dv), lambda i: (i, 0)),   # video tokens (blocked)
            pl.BlockSpec((dv, e),      lambda i: (0, 0)),   # wv     (resident)
            pl.BlockSpec((1, e),       lambda i: (0, 0)),   # bv     (resident)
            pl.BlockSpec((e, l),       lambda i: (0, 0)),   # ntf_t  (resident)
            pl.BlockSpec((l, e),       lambda i: (0, 0)),   # ntf_s  (resident)
            pl.BlockSpec((nb, l),      lambda i: (i, 0)),   # one-hot targets
        ],
        out_specs=pl.BlockSpec((nb, 1), lambda i: (i, 0)),
        compiler_params=pltpu.CompilerParams(
            dimension_semantics=("parallel",),              # 2-TC sharding on v7x
            vmem_limit_bytes=48 * 1024 * 1024,              # < v7x 64 MiB physical
        ),
    )(video_flat,
      wv.astype(jnp.bfloat16),
      bv.reshape(1, -1).astype(jnp.float32),
      ntf_t, ntf_s,
      sim_targets.astype(jnp.float32))

    # padded rows carry all-zero targets -> exactly zero contribution
    return jnp.sum(per_sample) / float(n)


# ----------------------- plain-JAX reference (for check) -----------------------
def reference_loss(video_embeds, text_cls, wv, bv, wt, bt, sim_targets, temp):
    # Mirrors the kernel's mixed precision: bf16 operands into every MXU
    # contraction, f32 accumulation and all elementwise math in f32.
    temp = jnp.clip(temp, 0.001, 0.5)
    tfr = jnp.dot(text_cls.astype(jnp.bfloat16), wt.astype(jnp.bfloat16),
                  preferred_element_type=jnp.float32) + bt
    ntf = _l2norm(tfr)                                                     # [L, E]
    vfr = jnp.einsum('ntd,de->nte', video_embeds.astype(jnp.bfloat16),
                     wv.astype(jnp.bfloat16),
                     preferred_element_type=jnp.float32) + bv              # [N, T, E]
    nvf = _l2norm(vfr)
    scores = jnp.einsum('nte,le->ntl', nvf.astype(jnp.bfloat16),
                        ntf.astype(jnp.bfloat16),
                        preferred_element_type=jnp.float32)
    act = jax.nn.sigmoid(scores * 10.0)
    vf = jnp.einsum('ntl,nte->nle', act.astype(jnp.bfloat16),
                    vfr.astype(jnp.bfloat16),
                    preferred_element_type=jnp.float32)
    vfn = _l2norm(vf)
    sim = jnp.einsum('nle,le->nl', vfn, ntf) / temp
    logsm = jax.nn.log_softmax(sim, axis=1)
    return -jnp.sum(logsm * sim_targets, axis=1).mean()


if __name__ == "__main__":
    key = jax.random.PRNGKey(0)
    kimg, ktxt, kvenc, kwv, kbv, kwt, kbt, klab = jax.random.split(key, 8)

    # small shapes consistent with the module's forward
    B, NUM_SEGS = 2, 1                   # label length matches B*num_segs
    C_IN, T, H, W = 4, 8, 16, 16         # heatmap volume (N, C, T, H, W)
    DV = 32                              # video_encoder.res_out_channels
    DT = 32                              # text_encoder.config.hidden_size
    E = 32                               # embed_dim
    L = 8                                # number of classes (text_lists rows)
    # NOTE: at real model scale, pad E/DV/DT to multiples of 128 (lane axis),
    # T to a multiple of 8 and L to 128 (mask padded class logits / zero their
    # targets) for unmasked vld/vst & full MXU width.

    imgs = jax.random.normal(kimg, (B, NUM_SEGS, C_IN, T, H, W), jnp.float32)
    label = jnp.array([3, 5], dtype=jnp.int32)

    # ---- stand-in video_encoder (PoseConv3D) ----
    # TODO(synk): real PoseConv3D backbone; replaced by spatial mean-pool +
    # fixed projection producing [N, T, DV] token features.
    n = B * NUM_SEGS
    x = imgs.reshape((n,) + imgs.shape[2:])              # [N, C, T, H, W] (NCTHW)
    x = jnp.mean(x, axis=(3, 4))                         # [N, C, T]
    x = jnp.transpose(x, (0, 2, 1))                      # [N, T, C] channels-last
    w_stub = 0.1 * jax.random.normal(kvenc, (C_IN, DV), jnp.float32)
    video_embeds = x @ w_stub                            # [N, T, DV]

    # ---- stand-in text_encoder (BERT CLS) ----
    # TODO(synk): BertTokenizer + BertModel; replaced by a fixed CLS table.
    text_cls = jax.random.normal(ktxt, (L, DT), jnp.float32)

    # ---- head parameters (deterministic init) ----
    wv = 0.05 * jax.random.normal(kwv, (DV, E), jnp.float32)   # vision_proj.weight.T
    bv = 0.01 * jax.random.normal(kbv, (E,), jnp.float32)
    wt = 0.05 * jax.random.normal(kwt, (DT, E), jnp.float32)   # text_proj.weight.T
    bt = 0.01 * jax.random.normal(kbt, (E,), jnp.float32)
    temp = jnp.float32(0.07)

    # sim_targets: one-hot of label (forward_train sets sim_targets[i][label[i]]=1)
    sim_targets = jax.nn.one_hot(label, L, dtype=jnp.float32)  # [N, L]

    loss = recognizerplus_loss(video_embeds, text_cls, wv, bv, wt, bt,
                               sim_targets, temp)
    loss = jax.block_until_ready(loss)

    ref = reference_loss(video_embeds, text_cls, wv, bv, wt, bt,
                         sim_targets, temp)
    ref = jax.block_until_ready(ref)

    assert jnp.isfinite(loss), "loss is not finite"
    assert jnp.allclose(loss, ref, rtol=1e-2, atol=1e-2), (loss, ref)
    print("KERNEL_OK")
</pallas_src>

<mosaic_0001>
module attributes {stable_mosaic.version = 11 : i64} {
  func.func @text_proj_kernel(%arg0: memref<8x32xbf16, #tpu.memory_space<vmem>>, %arg1: memref<32x32xbf16, #tpu.memory_space<vmem>>, %arg2: memref<1x32xf32, #tpu.memory_space<vmem>>, %arg3: memref<8x32xf32, #tpu.memory_space<vmem>>) attributes {dimension_semantics = [], scalar_prefetch = 0 : i64, scratch_operands = 0 : i64, tpu.core_type = #tpu.core_type<tc>} {
    %c0 = arith.constant 0 : index
    %c0_0 = arith.constant 0 : index
    %0 = vector.load %arg0[%c0, %c0_0] : memref<8x32xbf16, #tpu.memory_space<vmem>>, vector<8x32xbf16>
    %c0_1 = arith.constant 0 : index
    %c0_2 = arith.constant 0 : index
    %1 = vector.load %arg1[%c0_1, %c0_2] : memref<32x32xbf16, #tpu.memory_space<vmem>>, vector<32x32xbf16>
    %cst = arith.constant dense<0.000000e+00> : vector<8x32xf32>
    %2 = tpu.matmul %0, %1, %cst {dimension_numbers = #tpu.dot_dimension_numbers<[1], [0], [0], [1], [0, 0, 1, 1], [], []>} : vector<8x32xbf16>, vector<32x32xbf16>, vector<8x32xf32> -> vector<8x32xf32>
    %c0_3 = arith.constant 0 : index
    %c0_4 = arith.constant 0 : index
    %3 = vector.load %arg2[%c0_3, %c0_4] : memref<1x32xf32, #tpu.memory_space<vmem>>, vector<1x32xf32>
    %4 = vector.broadcast %3 : vector<1x32xf32> to vector<8x32xf32>
    %5 = arith.addf %2, %4 : vector<8x32xf32>
    %6 = arith.mulf %5, %5 : vector<8x32xf32>
    %cst_5 = arith.constant dense<0.000000e+00> : vector<8xf32>
    %7 = vector.multi_reduction <add>, %6, %cst_5 [1] : vector<8x32xf32> to vector<8xf32>
    %8 = vector.shape_cast %7 : vector<8xf32> to vector<8x1xf32>
    %cst_6 = arith.constant 1.000000e-24 : f32
    %9 = vector.broadcast %cst_6 : f32 to vector<8x1xf32>
    %10 = arith.maximumf %8, %9 : vector<8x1xf32>
    %11 = math.rsqrt %10 : vector<8x1xf32>
    %12 = vector.broadcast %11 : vector<8x1xf32> to vector<8x32xf32>
    %13 = arith.mulf %5, %12 : vector<8x32xf32>
    %c0_7 = arith.constant 0 : index
    %c0_8 = arith.constant 0 : index
    %14 = vector.load %arg3[%c0_7, %c0_8] : memref<8x32xf32, #tpu.memory_space<vmem>>, vector<8x32xf32>
    tpu.vector_store %arg3[%c0_7, %c0_8], %13 {strides = array<i32>} : memref<8x32xf32, #tpu.memory_space<vmem>>, vector<8x32xf32>,
    return
  }
}

</mosaic_0001>

<bundles_post_ra>
// kernel: tpu_custom_call.1
= control target key start
LH: loop header
LB: loop body
LE: loop exit
PB: predicated region body
PF: predicated region fallthrough
CT: control target
= control target key end

     0   :  { %8 = vsyncpa [#allocation3], 0  ;;  %s308_s0 = inlined_call_operand.hbm [shape: bf16[8,32], index: 0, kind: input, shape index: {}]   ;;  %s309_s1 = inlined_call_operand.hbm [shape: bf16[32,32], index: 1, kind: input, shape index: {}]   ;;  %s310_s2 = inlined_call_operand.vmem [shape: f32[1,32], index: 2, kind: input, shape index: {}]   ;;  %s311_s3 = inlined_call_operand.hbm [shape: f32[8,32], index: 3, kind: output, shape index: {}]  }
   0x1   :  { %9 = vsyncpa [#allocation6], 0 }
   0x2   :  { %10 = vsyncpa [#allocation4], 0  ;;  %s232_s12 = smov [#allocation2]   ;;  %s233_s14 = smov [#allocation5]  }
   0x3   :  { %s17_s13 = sshll.u32 %s232_s12, 4  ;;  %s26_s15 = sshll.u32 %s233_s14, 4  ;;  %s18_s13 = int_to_ptr.vmem [resolvable:$true] %s17_s13  ;;  %s259_s15 = int_to_ptr.vmem [resolvable:$true] %s26_s15 }
   0x4   :  { %s160_s18 = scalar_lea.hbm %s308_s0, 64 }
   0x5   :  { %p161_p0 = scmp.ne.s32.totalorder %s308_s0, %s160_s18  ;;  %p164_p1 = scmp.lt.u32.totalorder %s160_s18, %s308_s0 }
   0x7   :  { %p166_p2 = pnand %p164_p1, %p161_p0 }
   0x9   :  { %169 = shalt.err (!%p166_p2)
}
   0xa   :  { %s170_s23 = scalar_lea.vmem %s18_s13, 64  ;;  %p175_p4 = scmp.lt.s32.totalorder %s18_s13, %s18_s13 }
   0xb   :  { %p171_p3 = scmp.ne.s32.totalorder %s18_s13, %s170_s23  ;;  %p176_p5 = scmp.lt.s32.totalorder %s170_s23, %s170_s23 }
   0xd   :  { %p177_p6 = por %p176_p5, %p175_p4 }
   0xf   :  { %p178_p7 = pnand %p177_p6, %p171_p3 }
  0x11   :  { %181 = shalt.err (!%p178_p7)
}
  0x12   :  { %20 = dma.hbm_to_vmem [thread:$0]  %s308_s0, 64, %s18_s13, [#allocation3]  }
  0x13   :  { %s182_s28 = scalar_lea.hbm %s309_s1, 256 }
  0x14   :  { %p183_p8 = scmp.ne.s32.totalorder %s309_s1, %s182_s28  ;;  %p186_p9 = scmp.lt.u32.totalorder %s182_s28, %s309_s1 }
  0x16   :  { %p188_p10 = pnand %p186_p9, %p183_p8 }
  0x18   :  { %191 = shalt.err (!%p188_p10)
}
  0x19   :  { %s192_s6 = scalar_lea.vmem %s259_s15, 256  ;;  %p197_p12 = scmp.lt.s32.totalorder %s259_s15, %s259_s15 }
  0x1a   :  { %p193_p11 = scmp.ne.s32.totalorder %s259_s15, %s192_s6  ;;  %p198_p13 = scmp.lt.s32.totalorder %s192_s6, %s192_s6 }
  0x1c   :  { %p199_p0 = por %p198_p13, %p197_p12 }
  0x1e   :  { %p200_p1 = pnand %p199_p0, %p193_p11 }
  0x20   :  { %203 = shalt.err (!%p200_p1)
}
  0x21   :  { %s234_s0 = smov 64   ;;  %s235_s7 = smov 4  }
  0x22   :  { %32 = dma.hbm_to_vmem [thread:$0]  %s309_s1, 256, %s259_s15, [#allocation6], %s234_s0, %s234_s0, %s235_s7  }
  0x23   :  { %226 = dma.done.wait [#allocation3], 64  }
  0x24   :  { %227 = vsyncadd [#allocation3], 4294967232 }
  0x25   :  { %228 = dma.done.wait [#allocation6], 256  }
  0x26   :  { %229 = vsyncadd [#allocation6], 4294967040  ;;  %v236_v0 = vmov 0.0   ;;  %vm237_vm0 = vmmov 0   ;;  %v156_v1 = vld [vmem:[#allocation5] sm:$0xff]   ;;  %v157_v2 = vld [vmem:[#allocation5 + $0x8] sm:$0xff]  }
  0x27   :  { %141 = vmatprep.subr.bf16.mxu0 %v236_v0  ;;  %145 = vmatprep.mubr.msk.bf16.mxu0 %vm237_vm0, %v236_v0  ;;  %v42_v3 = vld [vmem:[#allocation2] sm:$0xf]  ;;  %vm66_vm1 = vcmask 261120   ;;  %s238_s1 = smov [#allocation7]  }
  0x28   :  { %142 = vmatpush3.bf16.msra.mxu0 %v156_v1  ;;  %v134_v4 = vld [vmem:[%s310_s2] ss:$0 sm:$0xff]  ;;  %s124_s12 = sshll.u32 %s238_s1, 4  ;;  %s125_s12 = int_to_ptr.vmem [resolvable:$true] %s124_s12 }
  0x29   :  { %143 = vmatprep.subr.bf16.mxu0 %v236_v0  ;;  %s204_s2 = scalar_lea.vmem %s125_s12, 128  ;;  %p209_p3 = scmp.lt.s32.totalorder %s125_s12, %s125_s12 }
  0x2a   :  { %p205_p2 = scmp.ne.s32.totalorder %s125_s12, %s204_s2  ;;  %p210_p4 = scmp.lt.s32.totalorder %s204_s2, %s204_s2 }
  0x2c   :  { %144 = vmatpush3.bf16.msra.mxu0 %v157_v2  ;;  %p211_p5 = por %p210_p4, %p209_p3 }
  0x2e   :  { %p212_p6 = pnand %p211_p5, %p205_p2 }
  0x2f   :  { %146 = vmatmul.mubr.msk.bf16.vlgmr.msra.gmra.mrb[0].mxu0 %vm66_vm1, %v42_v3 }
 0x102   :  { %v104_v5 = vpop.f32.mrb[0].mxu0 }
 0x103   :  { %v105_v6 = vadd.f32 %v134_v4, %v104_v5  ;;  %v147_v7 = vpop.f32.mrb[1].mxu0 }
 0x104   :  { %v107_v8 = vpop.f32.mrb[2].mxu0 }
 0x105   :  { %v148_v9 = vpop.f32.mrb[3].mxu0  ;;  %v110_v10 = vmul.f32 %v105_v6, %v105_v6 }
 0x107   :  { %v111_v11 = vsel %vm66_vm1, %v110_v10, 0.0 }
 0x108   :  { %112 = vadd.xlane.f32.xlu0 %v111_v11 }
 0x195   :  { %v113_v12 = vpop.xlane.xlu0 %112 }
 0x196   :  { %v114_v13 = vmax.f32 %v113_v12, 1e-24 }
 0x198   :  { %158 = vrsqrt.f32 %v114_v13 }
 0x1a2   :  { %v159_v14 = vpop.eup %158 }
 0x1a3   :  { %v116_v15 = vmul.f32 %v159_v14, %v105_v6 }
 0x1a5   :  { %117 = vst.msk [vmem:[#allocation7] sm:$0xff] %vm66_vm1, %v116_v15 }
 0x1a6   :  { %215 = shalt.err (!%p212_p6)
}
 0x1a7   :  { %s216_s15 = scalar_lea.hbm %s311_s3, 128 }
 0x1a8   :  { %p217_p7 = scmp.ne.s32.totalorder %s311_s3, %s216_s15  ;;  %p220_p8 = scmp.lt.u32.totalorder %s216_s15, %s311_s3 }
 0x1aa   :  { %p222_p9 = pnand %p220_p8, %p217_p7 }
 0x1ac   :  { %225 = shalt.err (!%p222_p9)
}
 0x1ad   :  { %127 = dma.vmem_to_hbm [thread:$0]  %s125_s12, 128, %s311_s3, [#allocation4]  }
 0x1ae   :  { %230 = dma.done.wait [#allocation4], 128  }
 0x1af   :  { %231 = vsyncadd [#allocation4], 4294967168 }
 0x1b0   :  { %131 = vsyncpa [#allocation3], 1 }
 0x1b1   :  { %132 = vsyncpa [#allocation6], 1 }
 0x1b2   :  { %133 = vsyncpa [#allocation4], 1 }

</bundles_post_ra>
